<compile_context>
chip_gen: v6e
topology: v6e:2x2x1
jax: 0.10.0
libtpu: 0.0.40
codegen_flags: <defaults>
</compile_context>

<pallas_src>
import jax
import jax.numpy as jnp
import numpy as np
from jax.experimental import pallas as pl
from jax.experimental.pallas import tpu as pltpu


# ----------------------------------------------------------------------------
# Shared helper: pointwise (1x1x1) conv as Cin broadcast-FMAs on the VPU.
#   w: (Cout, Cin) f32,  x: (Cin, tile_s) f32  ->  (Cout, tile_s) f32
# ----------------------------------------------------------------------------
def _channel_mix(w, x):
    cin = x.shape[0]
    acc = w[:, 0:1] * x[0:1, :]
    for ci in range(1, cin):
        acc = acc + w[:, ci:ci + 1] * x[ci:ci + 1, :]
    return acc


# ----------------------------------------------------------------------------
# Pass 1: per-program partial per-channel sum / sum-of-squares of y = conv(x).
# Outputs are tiny (Cout, 1) partials -> both grid axes stay 'parallel'.
# ----------------------------------------------------------------------------
def conv_stats_kernel(w_ref, x_ref, sum_ref, ssq_ref):
    y = _channel_mix(w_ref[...], x_ref[...])          # (Cout, tile_s) f32
    sum_ref[...] = jnp.sum(y, axis=1, keepdims=True)  # (Cout, 1)
    ssq_ref[...] = jnp.sum(y * y, axis=1, keepdims=True)


# ----------------------------------------------------------------------------
# Pass 2: fused conv (BN scale folded into the weights) + BN shift + ReLU.
# ----------------------------------------------------------------------------
def conv_bn_act_kernel(w_ref, b_ref, x_ref, o_ref):
    y = _channel_mix(w_ref[...], x_ref[...]) + b_ref[...]   # (Cout, tile_s)
    # TODO(synk): only the default act_func='relu' is emitted here.
    o_ref[...] = jnp.maximum(y, 0.0).astype(o_ref.dtype)


def _pick_tile_s(s, max_tile):
    """Largest lane-aligned spatial tile that divides S (or the full S)."""
    if s <= max_tile:
        return s
    t = (max_tile // 128) * 128
    while t >= 128:
        if s % t == 0:
            return t
        t -= 128
    return s  # fallback: one full-spatial block per (n)


def mixed_dcbr_forward(x_ncdhw, conv_w, gamma, beta, *, eps=1e-5,
                       max_tile_s=2048):
    """MixedDCBRLayer forward: Conv3d(1x1x1, no bias) -> BN3d(train) -> ReLU."""
    N, Cin, D, H, W = x_ncdhw.shape
    Cout = conv_w.shape[0]
    S = D * H * W
    tile_s = _pick_tile_s(S, max_tile_s)
    num_s = S // tile_s
    G = N * num_s
    Mtot = N * S

    # NCDHW is already (N, C, D*H*W)-contiguous: pure reshape, no transpose.
    x3 = x_ncdhw.reshape(N, Cin, S).astype(jnp.float32)
    w2 = conv_w.reshape(Cout, Cin).astype(jnp.float32)

    grid = (N, num_s)
    cparams = pltpu.CompilerParams(
        dimension_semantics=("parallel", "parallel"))
    # NOTE: live block footprint is ~(Cin + Cout) * tile_s * 4 B double-buffered
    # (~100 KiB here) -- far below the 32 MiB scoped-VMEM default even on v7x
    # (64 MiB physical).  Raise vmem_limit_bytes only for much larger C*tile_s.

    x_spec = pl.BlockSpec((None, Cin, tile_s), lambda n, s: (n, 0, s))
    w_spec = pl.BlockSpec((Cout, Cin), lambda n, s: (0, 0))
    part_spec = pl.BlockSpec((None, Cout, 1),
                             lambda n, s: (n * num_s + s, 0, 0))

    # --- Pass 1: partial channel statistics of y = conv(x) -----------------
    sum_parts, ssq_parts = pl.pallas_call(
        conv_stats_kernel,
        out_shape=(jax.ShapeDtypeStruct((G, Cout, 1), jnp.float32),
                   jax.ShapeDtypeStruct((G, Cout, 1), jnp.float32)),
        grid=grid,
        in_specs=[w_spec, x_spec],
        out_specs=(part_spec, part_spec),
        compiler_params=cparams,
    )(w2, x3)

    # BatchNorm3d training-mode batch statistics (biased variance), folded
    # into a per-channel scale on the conv weight plus a shift (tiny glue).
    col_sum = jnp.sum(sum_parts[:, :, 0], axis=0)     # (Cout,)
    col_ssq = jnp.sum(ssq_parts[:, :, 0], axis=0)     # (Cout,)
    mean = col_sum / Mtot
    var = col_ssq / Mtot - mean * mean
    scale = gamma / jnp.sqrt(var + eps)
    shift = beta - mean * scale
    w_eff = w2 * scale[:, None]                       # BN scale folded into conv
    shift2 = shift.reshape(Cout, 1).astype(jnp.float32)

    # --- Pass 2: recompute channel mix, fused BN + ReLU, lane-dense output --
    out3 = pl.pallas_call(
        conv_bn_act_kernel,
        out_shape=jax.ShapeDtypeStruct((N, Cout, S), jnp.float32),
        grid=grid,
        in_specs=[w_spec,
                  pl.BlockSpec((Cout, 1), lambda n, s: (0, 0)),
                  x_spec],
        out_specs=pl.BlockSpec((None, Cout, tile_s), lambda n, s: (n, 0, s)),
        compiler_params=cparams,
    )(w_eff, shift2, x3)

    # Output is already NCDHW-compatible: pure reshape back.
    return out3.reshape(N, Cout, D, H, W)


def reference_forward(x_ncdhw, conv_w, gamma, beta, eps=1e-5):
    """Pure-JAX reference mirroring the PyTorch module forward."""
    Cout, Cin = conv_w.shape[0], conv_w.shape[1]
    w = conv_w.reshape(Cout, Cin)
    y = jnp.einsum("ncdhw,oc->nodhw", x_ncdhw, w)        # Conv3d 1x1x1, no bias
    mean = y.mean(axis=(0, 2, 3, 4), keepdims=True)      # BN3d, training mode
    var = y.var(axis=(0, 2, 3, 4), keepdims=True)        # biased variance
    yn = (y - mean) / jnp.sqrt(var + eps)
    yn = yn * gamma.reshape(1, Cout, 1, 1, 1) + beta.reshape(1, Cout, 1, 1, 1)
    return jnp.maximum(yn, 0.0)                          # ReLU


if __name__ == "__main__":
    key = jax.random.PRNGKey(0)
    k_x, k_w, k_g, k_b = jax.random.split(key, 4)

    # Small shapes: N=2, Cin=4, D=8, H=16, W=32, Cout=8 -> S=4096, grid (2, 2)
    N, Cin, D, H, W = 2, 4, 8, 16, 32
    Cout = 8

    x = jax.random.normal(k_x, (N, Cin, D, H, W), dtype=jnp.float32)
    # Conv3d weight (Cout, Cin, 1, 1, 1); deterministic synthetic init.
    conv_w = jax.random.normal(k_w, (Cout, Cin, 1, 1, 1), dtype=jnp.float32) * 0.1
    # BatchNorm3d affine params (deterministic, near PyTorch defaults).
    gamma = 1.0 + 0.1 * jax.random.normal(k_g, (Cout,), dtype=jnp.float32)
    beta = 0.1 * jax.random.normal(k_b, (Cout,), dtype=jnp.float32)

    out = mixed_dcbr_forward(x, conv_w, gamma, beta)
    out = jax.block_until_ready(out)

    ref = reference_forward(x, conv_w, gamma, beta)
    np.testing.assert_allclose(np.asarray(out), np.asarray(ref),
                               rtol=1e-4, atol=1e-4)

    print("KERNEL_OK")
</pallas_src>

<mosaic_0001>
module attributes {stable_mosaic.version = 11 : i64} {
  func.func @conv_stats_kernel(%arg0: i32, %arg1: i32, %arg2: memref<8x4xf32, #tpu.memory_space<vmem>>, %arg3: memref<1x4x2048xf32, #tpu.memory_space<vmem>>, %arg4: memref<1x8x1xf32, #tpu.memory_space<vmem>>, %arg5: memref<1x8x1xf32, #tpu.memory_space<vmem>>) attributes {dimension_semantics = [#tpu.dimension_semantics<parallel>, #tpu.dimension_semantics<parallel>], iteration_bounds = array<i64: 2, 2>, scalar_prefetch = 0 : i64, scratch_operands = 0 : i64, tpu.core_type = #tpu.core_type<tc>, window_params = [{pipeline_mode = #tpu.pipeline_mode<synchronous>, transform_indices = @transform_0, window_bounds = array<i64: 8, 4>}, {transform_indices = @transform_1, window_bounds = array<i64: 1, 4, 2048>}, {transform_indices = @transform_2, window_bounds = array<i64: 1, 8, 1>}, {transform_indices = @transform_3, window_bounds = array<i64: 1, 8, 1>}]} {
    %c0 = arith.constant 0 : index
    %c0_0 = arith.constant 0 : index
    %0 = vector.load %arg2[%c0, %c0_0] : memref<8x4xf32, #tpu.memory_space<vmem>>, vector<8x4xf32>
    %c0_1 = arith.constant 0 : index
    %c0_2 = arith.constant 0 : index
    %c0_3 = arith.constant 0 : index
    %1 = vector.load %arg3[%c0_1, %c0_2, %c0_3] : memref<1x4x2048xf32, #tpu.memory_space<vmem>>, vector<1x4x2048xf32>
    %2 = vector.shape_cast %1 : vector<1x4x2048xf32> to vector<4x2048xf32>
    %3 = vector.extract_strided_slice %0 {offsets = [0, 0], sizes = [8, 1], strides = [1, 1]} : vector<8x4xf32> to vector<8x1xf32>
    %4 = vector.extract_strided_slice %2 {offsets = [0, 0], sizes = [1, 2048], strides = [1, 1]} : vector<4x2048xf32> to vector<1x2048xf32>
    %5 = vector.broadcast %3 : vector<8x1xf32> to vector<8x2048xf32>
    %6 = vector.broadcast %4 : vector<1x2048xf32> to vector<8x2048xf32>
    %7 = arith.mulf %5, %6 : vector<8x2048xf32>
    %8 = vector.extract_strided_slice %0 {offsets = [0, 1], sizes = [8, 1], strides = [1, 1]} : vector<8x4xf32> to vector<8x1xf32>
    %9 = vector.extract_strided_slice %2 {offsets = [1, 0], sizes = [1, 2048], strides = [1, 1]} : vector<4x2048xf32> to vector<1x2048xf32>
    %10 = vector.broadcast %8 : vector<8x1xf32> to vector<8x2048xf32>
    %11 = vector.broadcast %9 : vector<1x2048xf32> to vector<8x2048xf32>
    %12 = arith.mulf %10, %11 : vector<8x2048xf32>
    %13 = arith.addf %7, %12 : vector<8x2048xf32>
    %14 = vector.extract_strided_slice %0 {offsets = [0, 2], sizes = [8, 1], strides = [1, 1]} : vector<8x4xf32> to vector<8x1xf32>
    %15 = vector.extract_strided_slice %2 {offsets = [2, 0], sizes = [1, 2048], strides = [1, 1]} : vector<4x2048xf32> to vector<1x2048xf32>
    %16 = vector.broadcast %14 : vector<8x1xf32> to vector<8x2048xf32>
    %17 = vector.broadcast %15 : vector<1x2048xf32> to vector<8x2048xf32>
    %18 = arith.mulf %16, %17 : vector<8x2048xf32>
    %19 = arith.addf %13, %18 : vector<8x2048xf32>
    %20 = vector.extract_strided_slice %0 {offsets = [0, 3], sizes = [8, 1], strides = [1, 1]} : vector<8x4xf32> to vector<8x1xf32>
    %21 = vector.extract_strided_slice %2 {offsets = [3, 0], sizes = [1, 2048], strides = [1, 1]} : vector<4x2048xf32> to vector<1x2048xf32>
    %22 = vector.broadcast %20 : vector<8x1xf32> to vector<8x2048xf32>
    %23 = vector.broadcast %21 : vector<1x2048xf32> to vector<8x2048xf32>
    %24 = arith.mulf %22, %23 : vector<8x2048xf32>
    %25 = arith.addf %19, %24 : vector<8x2048xf32>
    %cst = arith.constant dense<0.000000e+00> : vector<8xf32>
    %26 = vector.multi_reduction <add>, %25, %cst [1] : vector<8x2048xf32> to vector<8xf32>
    %27 = vector.shape_cast %26 : vector<8xf32> to vector<8x1xf32>
    %c0_4 = arith.constant 0 : index
    %c0_5 = arith.constant 0 : index
    %c0_6 = arith.constant 0 : index
    %28 = vector.load %arg4[%c0_4, %c0_5, %c0_6] : memref<1x8x1xf32, #tpu.memory_space<vmem>>, vector<1x8x1xf32>
    %29 = vector.shape_cast %28 : vector<1x8x1xf32> to vector<8x1xf32>
    %30 = vector.shape_cast %27 : vector<8x1xf32> to vector<1x8x1xf32>
    tpu.vector_store %arg4[%c0_4, %c0_5, %c0_6], %30 {strides = array<i32>} : memref<1x8x1xf32, #tpu.memory_space<vmem>>, vector<1x8x1xf32>,
    %31 = arith.mulf %25, %25 : vector<8x2048xf32>
    %cst_7 = arith.constant dense<0.000000e+00> : vector<8xf32>
    %32 = vector.multi_reduction <add>, %31, %cst_7 [1] : vector<8x2048xf32> to vector<8xf32>
    %33 = vector.shape_cast %32 : vector<8xf32> to vector<8x1xf32>
    %c0_8 = arith.constant 0 : index
    %c0_9 = arith.constant 0 : index
    %c0_10 = arith.constant 0 : index
    %34 = vector.load %arg5[%c0_8, %c0_9, %c0_10] : memref<1x8x1xf32, #tpu.memory_space<vmem>>, vector<1x8x1xf32>
    %35 = vector.shape_cast %34 : vector<1x8x1xf32> to vector<8x1xf32>
    %36 = vector.shape_cast %33 : vector<8x1xf32> to vector<1x8x1xf32>
    tpu.vector_store %arg5[%c0_8, %c0_9, %c0_10], %36 {strides = array<i32>} : memref<1x8x1xf32, #tpu.memory_space<vmem>>, vector<1x8x1xf32>,
    return
  }
  func.func @transform_0(%arg0: i32, %arg1: i32) -> (i32, i32) {
    %c0_i32 = arith.constant 0 : i32
    %c0_i32_0 = arith.constant 0 : i32
    %c0_i32_1 = arith.constant 0 : i32
    return %c0_i32, %c0_i32_0 : i32, i32
  }
  func.func @transform_1(%arg0: i32, %arg1: i32) -> (i32, i32, i32) {
    %c0_i32 = arith.constant 0 : i32
    %c0_i32_0 = arith.constant 0 : i32
    return %arg0, %c0_i32, %arg1 : i32, i32, i32
  }
  func.func @transform_2(%arg0: i32, %arg1: i32) -> (i32, i32, i32) {
    %c2_i32 = arith.constant 2 : i32
    %0 = arith.muli %arg0, %c2_i32 : i32
    %1 = arith.addi %0, %arg1 : i32
    %c0_i32 = arith.constant 0 : i32
    %c0_i32_0 = arith.constant 0 : i32
    %c0_i32_1 = arith.constant 0 : i32
    return %1, %c0_i32, %c0_i32_0 : i32, i32, i32
  }
  func.func @transform_3(%arg0: i32, %arg1: i32) -> (i32, i32, i32) {
    %c2_i32 = arith.constant 2 : i32
    %0 = arith.muli %arg0, %c2_i32 : i32
    %1 = arith.addi %0, %arg1 : i32
    %c0_i32 = arith.constant 0 : i32
    %c0_i32_0 = arith.constant 0 : i32
    %c0_i32_1 = arith.constant 0 : i32
    return %1, %c0_i32, %c0_i32_0 : i32, i32, i32
  }
}

</mosaic_0001>

<bundles_post_ra>
// kernel: tpu_custom_call.1
= control target key start
LH: loop header
LB: loop body
LE: loop exit
PB: predicated region body
PF: predicated region fallthrough
CT: control target
= control target key end

     0   :  { %9 = vsyncpa [#allocation3], 0  ;;  %s1932_s0 = inlined_call_operand.vmem [shape: f32[8,4], index: 0, kind: input, shape index: {}]   ;;  %s1933_s1 = inlined_call_operand.hbm [shape: f32[2,4,4096], index: 1, kind: input, shape index: {}]   ;;  %s1934_s2 = inlined_call_operand.vmem [shape: f32[4,8,1], index: 2, kind: output, shape index: {0}]   ;;  %s1935_s3 = inlined_call_operand.vmem [shape: f32[4,8,1], index: 3, kind: output, shape index: {1}]  }
   0x1   :  { %11 = vsyncpa [#allocation3 + $0x1], 0  ;;  %s1353_s12 = smov 0   ;;  %s1355_s13 = smov 0  }
   0x2   :  { %s1357_s14 = smov 0   ;;  %s1359_s15 = smov 0  }
   0x3   :  { %s1361_s16 = smov 0   ;;  %s1363_s17 = smov 0  }
   0x4   :  { %s1365_s18 = smov 0   ;;  %s1367_s19 = smov 0  }
   0x5 LB: > { %s1132_s20 = sadd.s32 4294967295, %s1326_s19   ;;  %s26_s21 = sadd.s32 1, %s1318_s17  ;;  %s1326_s19 = sphi %s1367_s19, %s17_s19   ;;  %s1322_s18 = sphi %s1365_s18, %s1975_s18   ;;  %s1318_s17 = sphi %s1363_s17, %s1974_s17   ;;  %s1314_s16 = sphi %s1361_s16, %s1973_s16   ;;  %s1310_s15 = sphi %s1359_s15, %s1972_s15   ;;  %s1306_s14 = sphi %s1357_s14, %s1971_s14   ;;  %s1302_s13 = sphi %s1355_s13, %s1970_s13   ;;  %s1298_s12 = sphi %s1353_s12, %s1969_s12  }
   0x6   : > { %p27_p0 = scmp.ge.s32.totalorder %s26_s21, 2  ;;  %s29_s22 = sadd.s32 1, %s1322_s18 }
   0x7   : > { %s59_s23 = sadd.s32 1, %s1306_s14  ;;  %p66_p1 = scmp.ne.s32.totalorder %s1306_s14, %s1302_s13 }
   0x8   : > { %s1977_s21 = smov (%p27_p0, %s26_s21), 0  ;;  %s1979_s22 = smov (!%p27_p0, %s29_s22), %s1322_s18 }
   0x9   : > { %s55_s24 = ssub.s32 %s1318_s17, %s1977_s21  ;;  %p67_p2 = scmp.eq.s32.totalorder %s1326_s19, 0 }
   0xa   : > { %p31_p3 = scmp.ge.s32.totalorder %s1979_s22, 2  ;;  %p72_p4 = scmp.ne.s32.totalorder %s1302_s13, %s1298_s12 }
   0xb   : > { %p1404_p5 = por %p67_p2, %p66_p1  ;;  %p73_p6 = scmp.eq.s32.totalorder %s1132_s20, 0 }
   0xc   : > { %s1981_s22 = smov (%p31_p3, %s1979_s22), 0  ;;  %p1158_p8 = scmp.lt.s32.totalorder %s1326_s19, 4 }
   0xd   : > { %p1410_p7 = por %p73_p6, %p72_p4  ;;  %s54_s27 = ssub.s32 %s1322_s18, %s1981_s22 }
   0xe   : > { %s56_s28 = sor.u32 %s55_s24, %s54_s27  ;;  %s159_s29 = sand.u32 1, %s1306_s14  }
   0xf   : > { %p57_p9 = scmp.eq.s32.totalorder %s56_s28, 0  ;;  %s1140_s30 = sshll.u32 %s159_s29, 6 }
  0x10   : > { %s1141_s4 = sshll.u32 %s1318_s17, 4  ;;  %s1142_s6 = sshll.u32 %s1322_s18, 5 }
  0x11   : > { %s1420_s5 = scalar_select %p57_p9, %s1306_s14, %s59_s23  }
  0x12   : > { %s169_s7 = sadd.s32 %s1142_s6, %s1141_s4  ;;  %s163_s8 = scalar_lea.vmem [#allocation2], %s1140_s30 }
  0x13   : > { %s173_s9 = sshll.u32 %s163_s8, 4  ;;  %s1143_s10 = sshll.u32 %s169_s7, 6  ;;  %s174_s9 = int_to_ptr.vmem [resolvable:$true] %s173_s9 }
  0x14   : > { %s171_s20 = scalar_lea.hbm %s1933_s1, %s1143_s10  ;;  %p1430_p10 = pnand %p1158_p8, %p1404_p5 }
  0x15   : > { %p1144_p11 = scmp.ge.s32.totalorder %s1326_s19, 1  ;;  %p178_p12 = scmp.lt.s32.totalorder %s1326_s19, 5 }
  0x16   : > { %s160_s23 = scalar_lea.sflag [#allocation3], %s159_s29  ;;  %p1234_p13 = pneg %p1430_p10 }
  0x17   : > { %s1245_s27 = scalar_lea.vmem %s174_s9, 1024  ;;  %s1328_s28 = smov [#allocation2]  }
  0x18   : > { %p1246_p0 = scmp.ne.s32.totalorder %s174_s9, %s1245_s27  ;;  %s1250_s30 = sshll.u32 %s1328_s28, 4  ;;  %s1251_s30 = int_to_ptr.vmem [resolvable:$false] %s1250_s30 }
  0x19   : > { %s1252_s4 = scalar_lea.vmem %s1251_s30, 2048  ;;  %p1253_p3 = scmp.lt.s32.totalorder %s174_s9, %s1251_s30 }
  0x1a   : > { %p1248_p1 = pnand %p1246_p0, %p1234_p13  ;;  %p1254_p4 = scmp.lt.s32.totalorder %s1252_s4, %s1245_s27 }
  0x1c   : > { %p1249_p2 = pneg %p1248_p1  ;;  %p1255_p5 = por %p1254_p4, %p1253_p3 }
  0x1e   : > { %p1256_p6 = pnand %p1255_p5, %p1249_p2 }
  0x20   : > { %1259 = shalt.err (!%p1256_p6)
}
  0x21   : > { %1157 = dma.hbm_to_vmem [thread:$0]  (!%p1430_p10), %s171_s20, 1024, %s174_s9, %s160_s23  }
  0x22   : > { %p179_p8 = pnand %p1144_p11, %p178_p12 }
  0x24   : > { %182 = sbr.rel (%p179_p8) target bundleno = 360 (0x168), region = 28 }
  0x29   : > { %s184_s25 = sand.u32 1, %s1302_s13  }
  0x2a   : > { %s1145_s29 = sshll.u32 %s184_s25, 6  ;;  %s185_s6 = scalar_lea.sflag [#allocation3], %s184_s25 }
  0x2b   : > { %s1445_s7 = scalar_lea.vmem [#allocation2], %s1145_s29 }
  0x2c   : > { %1293 = dma.done.wait (%p1410_p7), %s185_s6, 1024  }
  0x2d   : > { %1295 = vsyncadd (%p1410_p7), %s185_s6, 4294966272  ;;  %v1329_v0 = vmov 0   ;;  %v1330_v1 = vmov 2   ;;  %v235_v2 = vld [vmem:[%s1932_s0] sm:$0xff]  ;;  %v1331_v3 = vmov 1   ;;  %v1332_v4 = vmov 3  }
  0x2e   : > { %1227 = vset.pattern.permute.xlu0 %v1329_v0  ;;  %1229 = vset.pattern.permute.xlu1 %v1330_v1  ;;  %v257_v5 = vlaneseq  ;;  %v1458_v8 = vld [vmem:[%s1445_s7] sm:$0xff]  ;;  %v1462_v10 = vld [vmem:[%s1445_s7 + $0x8] sm:$0xff]  ;;  %v1465_v11 = vld [vmem:[%s1445_s7 + $0x10] sm:$0xff]  ;;  %s1146_s26 = sshll.u32 %s1314_s16, 1  ;;  %vm974_vm0 = vcmask 7168  }
  0x2f   : > { %246 = vperm.xlu0 %1227, %v235_v2   ;;  %598 = vperm.xlu1 %1229, %v235_v2   ;;  %v1468_v12 = vld [vmem:[%s1445_s7 + $0x18] sm:$0xff]  ;;  %v1471_v13 = vld [vmem:[%s1445_s7 + $0x20] sm:$0xff]  ;;  %v1477_v15 = vld [vmem:[%s1445_s7 + $0x28] sm:$0xff]  ;;  %s220_s10 = sadd.s32 %s1310_s15, %s1146_s26 }
  0x30   : > { %v1454_v6 = vshrl.u32 %v257_v5, 7  ;;  %v1480_v16 = vld [vmem:[%s1445_s7 + $0x30] sm:$0xff]  ;;  %v1493_v21 = vld [vmem:[%s1445_s7 + $0x38] sm:$0xff]  ;;  %p221_p7 = scmp.lt.s32.totalorder %s220_s10, 3 }
  0x32   : > { %v259_v7 = vsub.s32 0, %v1454_v6  ;;  %v263_v9 = vsub.s32 4, %v1454_v6  ;;  %v1474_v14 = vsub.s32 1, %v1454_v6  ;;  %v1484_v18 = vsub.s32 5, %v1454_v6  ;;  %s1983_s10 = smov (!%p221_p7, %s220_s10), 3 }
  0x33   : > { %1228 = vset.pattern.permute.xlu0 %v1331_v3  ;;  %1230 = vset.pattern.permute.xlu1 %v1332_v4  ;;  %v1487_v19 = vsub.s32 2, %v1454_v6  ;;  %v1490_v20 = vsub.s32 6, %v1454_v6  ;;  %s1147_s11 = sshll.u32 %s1983_s10, 3 }
  0x34   : > { %418 = vperm.xlu0 %1228, %v235_v2   ;;  %778 = vperm.xlu1 %1230, %v235_v2   ;;  %v260_v17 = vrot.slane %v1458_v8, %v259_v7  ;;  %v264_v22 = vrot.slane %v1458_v8, %v263_v9  ;;  %v268_v23 = vrot.slane %v1462_v10, %v259_v7  ;;  %s224_s24 = scalar_lea.vmem %s1934_s2, %s1147_s11  ;;  %s232_s28 = scalar_lea.vmem %s1935_s3, %s1147_s11 }
  0x35   : > { %v272_v24 = vrot.slane %v1462_v10, %v263_v9  ;;  %v276_v25 = vrot.slane %v1465_v11, %v259_v7  ;;  %v280_v26 = vrot.slane %v1465_v11, %v263_v9  ;;  %v284_v27 = vrot.slane %v1468_v12, %v259_v7 }
  0x36   : > { %v288_v28 = vrot.slane %v1468_v12, %v263_v9  ;;  %v292_v29 = vrot.slane %v1471_v13, %v259_v7  ;;  %v296_v30 = vrot.slane %v1471_v13, %v263_v9  ;;  %v300_v31 = vrot.slane %v1477_v15, %v259_v7 }
  0x37   : > { %v304_v32 = vrot.slane %v1477_v15, %v263_v9  ;;  %v308_v33 = vrot.slane %v1480_v16, %v259_v7  ;;  %v312_v34 = vrot.slane %v1480_v16, %v263_v9  ;;  %v316_v35 = vrot.slane %v1493_v21, %v259_v7 }
  0x38   : > { %1231 = vset.pattern.permute.xlu0 %v1332_v4  ;;  %v320_v36 = vrot.slane %v1493_v21, %v263_v9  ;;  %v1510_v37 = vrot.slane %v260_v17, %v259_v7  ;;  %v1512_v38 = vrot.slane %v264_v22, %v259_v7  ;;  %v1514_v39 = vrot.slane %v268_v23, %v259_v7 }
  0x39   : > { %v1516_v40 = vrot.slane %v272_v24, %v259_v7  ;;  %v1518_v41 = vrot.slane %v276_v25, %v259_v7  ;;  %v1520_v42 = vrot.slane %v280_v26, %v259_v7  ;;  %v1522_v43 = vrot.slane %v284_v27, %v259_v7 }
  0x3a   : > { %v1524_v44 = vrot.slane %v288_v28, %v259_v7  ;;  %v1526_v45 = vrot.slane %v292_v29, %v259_v7  ;;  %v1528_v46 = vrot.slane %v296_v30, %v259_v7  ;;  %v1530_v47 = vrot.slane %v300_v31, %v259_v7 }
  0x3b   : > { %v1532_v48 = vrot.slane %v304_v32, %v259_v7  ;;  %v1534_v49 = vrot.slane %v308_v33, %v259_v7  ;;  %v1536_v50 = vrot.slane %v312_v34, %v259_v7  ;;  %v1538_v51 = vrot.slane %v316_v35, %v259_v7 }
  0x3c   : > { %v1540_v52 = vrot.slane %v320_v36, %v259_v7  ;;  %v424_v53 = vrot.slane %v1458_v8, %v1474_v14  ;;  %v428_v54 = vrot.slane %v1458_v8, %v1484_v18  ;;  %v432_v55 = vrot.slane %v1462_v10, %v1474_v14 }
  0x3d   : > { %v436_v56 = vrot.slane %v1462_v10, %v1484_v18  ;;  %v440_v57 = vrot.slane %v1465_v11, %v1474_v14  ;;  %v444_v58 = vrot.slane %v1465_v11, %v1484_v18  ;;  %v448_v59 = vrot.slane %v1468_v12, %v1474_v14 }
  0x3e   : > { %v452_v60 = vrot.slane %v1468_v12, %v1484_v18  ;;  %v456_v61 = vrot.slane %v1471_v13, %v1474_v14  ;;  %v460_v62 = vrot.slane %v1471_v13, %v1484_v18  ;;  %v464_v63 = vrot.slane %v1477_v15, %v1474_v14 }
  0x3f   : > { %v468_v0 = vrot.slane %v1477_v15, %v1484_v18  ;;  %v472_v1 = vrot.slane %v1480_v16, %v1474_v14  ;;  %v476_v2 = vrot.slane %v1480_v16, %v1484_v18  ;;  %v480_v3 = vrot.slane %v1493_v21, %v1474_v14 }
  0x40   : > { %v484_v4 = vrot.slane %v1493_v21, %v1484_v18  ;;  %v1575_v5 = vrot.slane %v424_v53, %v1474_v14  ;;  %v1578_v7 = vrot.slane %v428_v54, %v1474_v14  ;;  %v1581_v9 = vrot.slane %v432_v55, %v1474_v14 }
  0x41   : > { %v1584_v17 = vrot.slane %v436_v56, %v1474_v14  ;;  %v1587_v22 = vrot.slane %v440_v57, %v1474_v14  ;;  %v1590_v23 = vrot.slane %v444_v58, %v1474_v14  ;;  %v1593_v18 = vrot.slane %v448_v59, %v1474_v14 }
  0x42   : > { %v1596_v24 = vrot.slane %v452_v60, %v1474_v14  ;;  %v1599_v25 = vrot.slane %v456_v61, %v1474_v14  ;;  %v1602_v26 = vrot.slane %v460_v62, %v1474_v14  ;;  %v1605_v27 = vrot.slane %v464_v63, %v1474_v14 }
  0x43   : > { %v1608_v28 = vrot.slane %v468_v0, %v1474_v14  ;;  %v1611_v29 = vrot.slane %v472_v1, %v1474_v14  ;;  %v1614_v30 = vrot.slane %v476_v2, %v1474_v14  ;;  %v1617_v31 = vrot.slane %v480_v3, %v1474_v14 }
  0x44   : > { %v1620_v32 = vrot.slane %v484_v4, %v1474_v14  ;;  %v604_v33 = vrot.slane %v1458_v8, %v1487_v19  ;;  %v608_v34 = vrot.slane %v1458_v8, %v1490_v20  ;;  %v612_v35 = vrot.slane %v1462_v10, %v1487_v19 }
  0x45   : > { %1939 = vst [vmem:[#allocation5_spill] sm:$0xff] %v1614_v30  ;;  %1940 = vst [vmem:[#allocation6_spill] sm:$0xff] %v1617_v31  ;;  %v616_v36 = vrot.slane %v1462_v10, %v1490_v20  ;;  %v620_v53 = vrot.slane %v1465_v11, %v1487_v19  ;;  %v624_v54 = vrot.slane %v1465_v11, %v1490_v20  ;;  %v783_v3 = vsub.s32 3, %v1454_v6 }
  0x46   : > { %1941 = vst [vmem:[#allocation7_spill] sm:$0xff] %v1620_v32  ;;  %v628_v14 = vrot.slane %v1468_v12, %v1487_v19  ;;  %v632_v55 = vrot.slane %v1468_v12, %v1490_v20  ;;  %v636_v56 = vrot.slane %v1471_v13, %v1487_v19  ;;  %v640_v57 = vrot.slane %v1471_v13, %v1490_v20 }
  0x47   : > { %v644_v58 = vrot.slane %v1477_v15, %v1487_v19  ;;  %v648_v59 = vrot.slane %v1477_v15, %v1490_v20  ;;  %v652_v60 = vrot.slane %v1480_v16, %v1487_v19  ;;  %v656_v61 = vrot.slane %v1480_v16, %v1490_v20 }
  0x48   : > { %v660_v62 = vrot.slane %v1493_v21, %v1487_v19  ;;  %v664_v63 = vrot.slane %v1493_v21, %v1490_v20  ;;  %v1655_v0 = vrot.slane %v604_v33, %v1487_v19  ;;  %v1658_v1 = vrot.slane %v608_v34, %v1487_v19 }
  0x49   : > { %v1661_v2 = vrot.slane %v612_v35, %v1487_v19  ;;  %v787_v4 = vsub.s32 7, %v1454_v6  ;;  %v1668_v31 = vrot.slane %v616_v36, %v1487_v19  ;;  %v1671_v20 = vrot.slane %v620_v53, %v1487_v19 }
  0x4a   : > { %v1674_v33 = vrot.slane %v624_v54, %v1487_v19  ;;  %v1677_v34 = vrot.slane %v628_v14, %v1487_v19  ;;  %v1680_v35 = vrot.slane %v632_v55, %v1487_v19  ;;  %v1683_v30 = vrot.slane %v636_v56, %v1487_v19 }
  0x4b   : > { %1942 = vst [vmem:[#allocation8_spill] sm:$0xff] %v1671_v20  ;;  %v1686_v6 = vrot.slane %v640_v57, %v1487_v19  ;;  %v1689_v36 = vrot.slane %v644_v58, %v1487_v19  ;;  %v1692_v53 = vrot.slane %v648_v59, %v1487_v19  ;;  %v1695_v54 = vrot.slane %v652_v60, %v1487_v19 }
  0x4c   : > { %1943 = vst [vmem:[#allocation9_spill] sm:$0xff] %v1674_v33  ;;  %1944 = vst [vmem:[#allocation10_spill] sm:$0xff] %v1677_v34  ;;  %v1698_v14 = vrot.slane %v656_v61, %v1487_v19  ;;  %v1701_v55 = vrot.slane %v660_v62, %v1487_v19  ;;  %v1704_v56 = vrot.slane %v664_v63, %v1487_v19 }
  0x4d   : > { %1945 = vst [vmem:[#allocation11_spill] sm:$0xff] %v1680_v35  ;;  %1946 = vst [vmem:[#allocation12_spill] sm:$0xff] %v1683_v30  ;;  %v784_v57 = vrot.slane %v1458_v8, %v783_v3  ;;  %v788_v58 = vrot.slane %v1458_v8, %v787_v4  ;;  %v796_v59 = vrot.slane %v1462_v10, %v787_v4 }
  0x4e   : > { %1947 = vst [vmem:[#allocation13_spill] sm:$0xff] %v1686_v6  ;;  %1948 = vst [vmem:[#allocation14_spill] sm:$0xff] %v1689_v36  ;;  %v792_v36 = vrot.slane %v1462_v10, %v783_v3  ;;  %v800_v60 = vrot.slane %v1465_v11, %v783_v3  ;;  %v808_v61 = vrot.slane %v1468_v12, %v783_v3 }
  0x4f   : > { %1949 = vst [vmem:[#allocation15_spill] sm:$0xff] %v1692_v53  ;;  %1950 = vst [vmem:[#allocation16_spill] sm:$0xff] %v1695_v54  ;;  %v804_v54 = vrot.slane %v1465_v11, %v787_v4  ;;  %v812_v62 = vrot.slane %v1468_v12, %v787_v4  ;;  %v820_v19 = vrot.slane %v1471_v13, %v787_v4 }
  0x50   : > { %1951 = vst [vmem:[#allocation17_spill] sm:$0xff] %v1698_v14  ;;  %1952 = vst [vmem:[#allocation18_spill] sm:$0xff] %v1701_v55  ;;  %v816_v55 = vrot.slane %v1471_v13, %v783_v3  ;;  %v824_v63 = vrot.slane %v1477_v15, %v783_v3  ;;  %v828_v8 = vrot.slane %v1477_v15, %v787_v4 }
  0x51   : > { %1953 = vst [vmem:[#allocation19_spill] sm:$0xff] %v1704_v56  ;;  %v832_v10 = vrot.slane %v1480_v16, %v783_v3  ;;  %v836_v14 = vrot.slane %v1480_v16, %v787_v4  ;;  %v840_v11 = vrot.slane %v1493_v21, %v783_v3  ;;  %v844_v53 = vrot.slane %v1493_v21, %v787_v4 }
  0x52   : > { %v864_v6 = vrot.slane %v784_v57, %v783_v3  ;;  %v868_v12 = vrot.slane %v788_v58, %v783_v3  ;;  %v872_v30 = vrot.slane %v792_v36, %v783_v3  ;;  %v1726_v13 = vrot.slane %v796_v59, %v783_v3 }
  0x53   : > { %v1728_v34 = vrot.slane %v800_v60, %v783_v3  ;;  %v1730_v33 = vrot.slane %v804_v54, %v783_v3  ;;  %v1732_v15 = vrot.slane %v808_v61, %v783_v3  ;;  %v1738_v21 = vrot.slane %v812_v62, %v783_v3 }
  0x54   : > { %v1740_v4 = vrot.slane %v816_v55, %v783_v3  ;;  %v1742_v36 = vrot.slane %v820_v19, %v783_v3  ;;  %v1744_v57 = vrot.slane %v824_v63, %v783_v3  ;;  %v1746_v58 = vrot.slane %v828_v8, %v783_v3 }
  0x55   : > { %v1748_v54 = vrot.slane %v832_v10, %v783_v3  ;;  %v1754_v60 = vrot.slane %v836_v14, %v783_v3  ;;  %v1764_v19 = vrot.slane %v844_v53, %v783_v3 }
  0xaa   : > { %v1665_v32 = vpop.permute.xlu0 %246  ;;  %v1724_v35 = vpop.permute.xlu1 %598 }
  0xab   : > { %v401_v59 = vmul.f32 %v1510_v37, %v1665_v32  ;;  %v403_v55 = vmul.f32 %v1514_v39, %v1665_v32  ;;  %v404_v61 = vmul.f32 %v1516_v40, %v1665_v32  ;;  %v405_v37 = vmul.f32 %v1518_v41, %v1665_v32 }
  0xac   : > { %v407_v39 = vmul.f32 %v1522_v43, %v1665_v32  ;;  %v408_v40 = vmul.f32 %v1524_v44, %v1665_v32  ;;  %v1782_v41 = vmul.f32 %v1530_v47, %v1665_v32  ;;  %v746_v43 = vmul.f32 %v1658_v1, %v1724_v35 }
  0xad   : > { %v1792_v44 = vmul.f32 %v1532_v48, %v1665_v32  ;;  %v1804_v1 = vmul.f32 %v1536_v50, %v1665_v32  ;;  %v1808_v48 = vmul.f32 %v1538_v51, %v1665_v32  ;;  %v748_v50 = vmul.f32 %v1668_v31, %v1724_v35 }
  0xaf   : > { %v1717_v56 = vpop.permute.xlu0 %418  ;;  %v1770_v8 = vpop.permute.xlu1 %778 }
  0xb0   : > { %v565_v16 = vmul.f32 %v1575_v5, %v1717_v56  ;;  %v566_v20 = vmul.f32 %v1578_v7, %v1717_v56  ;;  %v402_v5 = vmul.f32 %v1512_v38, %v1665_v32  ;;  %v1756_v7 = vrot.slane %v840_v11, %v783_v3 }
  0xb1   : > { %v567_v62 = vmul.f32 %v1581_v9, %v1717_v56  ;;  %v406_v38 = vmul.f32 %v1520_v42, %v1665_v32  ;;  %v409_v9 = vmul.f32 %v1526_v45, %v1665_v32  ;;  %v410_v3 = vmul.f32 %v1528_v46, %v1665_v32 }
  0xb2   : > { %v581_v14 = vadd.f32 %v565_v16, %v401_v59  ;;  %v582_v63 = vadd.f32 %v566_v20, %v402_v5  ;;  %v568_v42 = vmul.f32 %v1584_v17, %v1717_v56  ;;  %v745_v20 = vmul.f32 %v1655_v0, %v1724_v35 }
  0xb3   : > { %v1796_v45 = vmul.f32 %v1534_v49, %v1665_v32  ;;  %v569_v46 = vmul.f32 %v1587_v22, %v1717_v56  ;;  %v583_v47 = vadd.f32 %v567_v62, %v403_v55  ;;  %v925_v10 = vmul.f32 %v864_v6, %v1770_v8 }
  0xb4   : > { %v761_v53 = vadd.f32 %v745_v20, %v581_v14  ;;  %v762_v17 = vadd.f32 %v746_v43, %v582_v63  ;;  %v926_v0 = vmul.f32 %v868_v12, %v1770_v8  ;;  %v1812_v49 = vmul.f32 %v1540_v52, %v1665_v32 }
  0xb5   : > { %v747_v22 = vmul.f32 %v1661_v2, %v1724_v35  ;;  %v570_v6 = vmul.f32 %v1590_v23, %v1717_v56  ;;  %v571_v11 = vmul.f32 %v1593_v18, %v1717_v56  ;;  %v584_v12 = vadd.f32 %v568_v42, %v404_v61 }
  0xb6   : > { %v572_v51 = vmul.f32 %v1596_v24, %v1717_v56  ;;  %v573_v52 = vmul.f32 %v1599_v25, %v1717_v56  ;;  %v574_v32 = vmul.f32 %v1602_v26, %v1717_v56  ;;  %v585_v2 = vadd.f32 %v569_v46, %v405_v37  ;;  %v1954_v25 = vld [vmem:[#allocation8_spill] sm:$0xff]  ;;  %v1955_v26 = vld [vmem:[#allocation5_spill] sm:$0xff] }
  0xb7   : > { %v763_v16 = vadd.f32 %v747_v22, %v583_v47  ;;  %v927_v23 = vmul.f32 %v872_v30, %v1770_v8  ;;  %v941_v59 = vadd.f32 %v925_v10, %v761_v53  ;;  %v942_v5 = vadd.f32 %v926_v0, %v762_v17  ;;  %v1957_v47 = vld [vmem:[#allocation6_spill] sm:$0xff] }
  0xb8   : > { %v575_v18 = vmul.f32 %v1605_v27, %v1717_v56  ;;  %v576_v31 = vmul.f32 %v1608_v28, %v1717_v56  ;;  %v577_v24 = vmul.f32 %v1611_v29, %v1717_v56  ;;  %v749_v55 = vmul.f32 %v1954_v25, %v1724_v35  ;;  %v1956_v27 = vld [vmem:[#allocation9_spill] sm:$0xff] }
  0xb9   : > { %v578_v61 = vmul.f32 %v1955_v26, %v1717_v56  ;;  %v586_v62 = vadd.f32 %v570_v6, %v406_v38  ;;  %v764_v37 = vadd.f32 %v748_v50, %v584_v12  ;;  %v928_v30 = vmul.f32 %v1726_v13, %v1770_v8  ;;  %v1958_v38 = vld [vmem:[#allocation7_spill] sm:$0xff] }
  0xba   : > { %v587_v14 = vadd.f32 %v571_v11, %v407_v39  ;;  %v750_v63 = vmul.f32 %v1956_v27, %v1724_v35  ;;  %v765_v42 = vadd.f32 %v749_v55, %v585_v2  ;;  %v929_v28 = vmul.f32 %v1728_v34, %v1770_v8  ;;  %v1959_v39 = vld [vmem:[#allocation10_spill] sm:$0xff]  ;;  %v1960_v12 = vld [vmem:[#allocation11_spill] sm:$0xff] }
  0xbb   : > { %v943_v29 = vadd.f32 %v927_v23, %v763_v16  ;;  %v957_v20 = vadd.f32 %v942_v5, %v941_v59  ;;  %v976_v43 = vmul.f32 %v941_v59, %v941_v59  ;;  %v977_v46 = vmul.f32 %v942_v5, %v942_v5  ;;  %v1961_v5 = vld [vmem:[#allocation12_spill] sm:$0xff] }
  0xbc   : > { %v579_v53 = vmul.f32 %v1957_v47, %v1717_v56  ;;  %v1849_v17 = vmul.f32 %v1958_v38, %v1717_v56  ;;  %v588_v13 = vadd.f32 %v572_v51, %v408_v40  ;;  %v751_v10 = vmul.f32 %v1959_v39, %v1724_v35 }
  0xbd   : > { %v766_v0 = vadd.f32 %v750_v63, %v586_v62  ;;  %v930_v22 = vmul.f32 %v1730_v33, %v1770_v8  ;;  %v944_v34 = vadd.f32 %v928_v30, %v764_v37  ;;  %v958_v6 = vadd.f32 %v957_v20, %v943_v29 }
  0xbe   : > { %v589_v11 = vadd.f32 %v573_v52, %v409_v9  ;;  %v752_v50 = vmul.f32 %v1960_v12, %v1724_v35  ;;  %v767_v2 = vadd.f32 %v751_v10, %v587_v14  ;;  %v931_v16 = vmul.f32 %v1732_v15, %v1770_v8  ;;  %v1962_v15 = vld [vmem:[#allocation13_spill] sm:$0xff] }
  0xbf   : > { %v945_v56 = vadd.f32 %v929_v28, %v765_v42  ;;  %v959_v23 = vadd.f32 %v958_v6, %v944_v34  ;;  %v978_v40 = vmul.f32 %v943_v29, %v943_v29  ;;  %v992_v51 = vadd.f32 %v977_v46, %v976_v43 }
  0xc0   : > { %v590_v59 = vadd.f32 %v574_v32, %v410_v3  ;;  %v753_v25 = vmul.f32 %v1961_v5, %v1724_v35  ;;  %v768_v55 = vadd.f32 %v752_v50, %v588_v13  ;;  %v932_v33 = vmul.f32 %v1738_v21, %v1770_v8  ;;  %v1963_v21 = vld [vmem:[#allocation14_spill] sm:$0xff] }
  0xc1   : > { %v946_v9 = vadd.f32 %v930_v22, %v766_v0  ;;  %v960_v52 = vadd.f32 %v959_v23, %v945_v56  ;;  %v979_v26 = vmul.f32 %v944_v34, %v944_v34  ;;  %v993_v62 = vadd.f32 %v992_v51, %v978_v40  ;;  %v1967_v5 = vld [vmem:[#allocation18_spill] sm:$0xff] }
  0xc2   : > { %v591_v37 = vadd.f32 %v575_v18, %v1782_v41  ;;  %v754_v30 = vmul.f32 %v1962_v15, %v1724_v35  ;;  %v769_v14 = vadd.f32 %v753_v25, %v589_v11  ;;  %v933_v3 = vmul.f32 %v1740_v4, %v1770_v8  ;;  %v1964_v4 = vld [vmem:[#allocation15_spill] sm:$0xff] }
  0xc3   : > { %v947_v32 = vadd.f32 %v931_v16, %v767_v2  ;;  %v961_v27 = vadd.f32 %v960_v52, %v946_v9  ;;  %v980_v63 = vmul.f32 %v945_v56, %v945_v56  ;;  %v994_v42 = vadd.f32 %v993_v62, %v979_v26 }
  0xc4   : > { %v592_v28 = vadd.f32 %v576_v31, %v1792_v44  ;;  %v755_v29 = vmul.f32 %v1963_v21, %v1724_v35  ;;  %v770_v20 = vadd.f32 %v754_v30, %v590_v59  ;;  %v934_v41 = vmul.f32 %v1742_v36, %v1770_v8  ;;  %v1965_v36 = vld [vmem:[#allocation16_spill] sm:$0xff] }
  0xc5   : > { %v948_v18 = vadd.f32 %v932_v33, %v768_v55  ;;  %v962_v43 = vadd.f32 %v961_v27, %v947_v32  ;;  %v981_v46 = vmul.f32 %v946_v9, %v946_v9  ;;  %v995_v47 = vadd.f32 %v994_v42, %v980_v63 }
  0xc6   : > { %v593_v38 = vadd.f32 %v577_v24, %v1796_v45  ;;  %v756_v13 = vmul.f32 %v1964_v4, %v1724_v35  ;;  %v771_v39 = vadd.f32 %v755_v29, %v591_v37  ;;  %v935_v44 = vmul.f32 %v1744_v57, %v1770_v8  ;;  %v1966_v57 = vld [vmem:[#allocation17_spill] sm:$0xff] }
  0xc7   : > { %v949_v31 = vadd.f32 %v933_v3, %v769_v14  ;;  %v963_v10 = vadd.f32 %v962_v43, %v948_v18  ;;  %v982_v0 = vmul.f32 %v947_v32, %v947_v32  ;;  %v996_v22 = vadd.f32 %v995_v47, %v981_v46 }
  0xc8   : > { %v594_v34 = vadd.f32 %v578_v61, %v1804_v1  ;;  %v757_v6 = vmul.f32 %v1965_v36, %v1724_v35  ;;  %v772_v11 = vadd.f32 %v756_v13, %v592_v28  ;;  %v936_v45 = vmul.f32 %v1746_v58, %v1770_v8 }
  0xc9   : > { %v950_v24 = vadd.f32 %v934_v41, %v770_v20  ;;  %v964_v12 = vadd.f32 %v963_v10, %v949_v31  ;;  %v983_v50 = vmul.f32 %v948_v18, %v948_v18  ;;  %v997_v2 = vadd.f32 %v996_v22, %v982_v0 }
  0xca   : > { %v595_v16 = vadd.f32 %v579_v53, %v1808_v48  ;;  %v758_v56 = vmul.f32 %v1966_v57, %v1724_v35  ;;  %v773_v23 = vadd.f32 %v757_v6, %v593_v38  ;;  %v937_v1 = vmul.f32 %v1748_v54, %v1770_v8  ;;  %v1968_v54 = vld [vmem:[#allocation19_spill] sm:$0xff] }
  0xcb   : > { %v951_v61 = vadd.f32 %v935_v44, %v771_v39  ;;  %v965_v40 = vadd.f32 %v964_v12, %v950_v24  ;;  %v984_v51 = vmul.f32 %v949_v31, %v949_v31  ;;  %v998_v59 = vadd.f32 %v997_v2, %v983_v50 }
  0xcc   : > { %v596_v58 = vadd.f32 %v1849_v17, %v1812_v49  ;;  %v759_v25 = vmul.f32 %v1967_v5, %v1724_v35  ;;  %v774_v55 = vadd.f32 %v758_v56, %v594_v34  ;;  %v938_v48 = vmul.f32 %v1754_v60, %v1770_v8 }
  0xcd   : > { %v952_v53 = vadd.f32 %v936_v45, %v772_v11  ;;  %v966_v33 = vadd.f32 %v965_v40, %v951_v61  ;;  %v985_v9 = vmul.f32 %v950_v24, %v950_v24  ;;  %v999_v52 = vadd.f32 %v998_v59, %v984_v51 }
  0xce   : > { %v760_v26 = vmul.f32 %v1968_v54, %v1724_v35  ;;  %v775_v62 = vadd.f32 %v759_v25, %v595_v16  ;;  %v939_v37 = vmul.f32 %v1756_v7, %v1770_v8  ;;  %v953_v15 = vadd.f32 %v937_v1, %v773_v23 }
  0xcf   : > { %v967_v49 = vadd.f32 %v966_v33, %v952_v53  ;;  %v986_v17 = vmul.f32 %v951_v61, %v951_v61  ;;  %v1000_v30 = vadd.f32 %v999_v52, %v985_v9  ;;  %v940_v3 = vmul.f32 %v1764_v19, %v1770_v8 }
  0xd0   : > { %v776_v14 = vadd.f32 %v760_v26, %v596_v58  ;;  %v954_v60 = vadd.f32 %v938_v48, %v774_v55  ;;  %v987_v27 = vmul.f32 %v952_v53, %v952_v53  ;;  %v955_v42 = vadd.f32 %v939_v37, %v775_v62 }
  0xd1   : > { %v968_v32 = vadd.f32 %v967_v49, %v953_v15  ;;  %v1001_v63 = vadd.f32 %v1000_v30, %v986_v17  ;;  %v988_v35 = vmul.f32 %v953_v15, %v953_v15 }
  0xd2   : > { %v956_v29 = vadd.f32 %v940_v3, %v776_v14  ;;  %v989_v20 = vmul.f32 %v954_v60, %v954_v60  ;;  %v990_v43 = vmul.f32 %v955_v42, %v955_v42 }
  0xd3   : > { %v969_v28 = vadd.f32 %v968_v32, %v954_v60  ;;  %v1002_v21 = vadd.f32 %v1001_v63, %v987_v27 }
  0xd4   : > { %v991_v47 = vmul.f32 %v956_v29, %v956_v29 }
  0xd5   : > { %v970_v7 = vadd.f32 %v969_v28, %v955_v42  ;;  %v1003_v41 = vadd.f32 %v1002_v21, %v988_v35 }
  0xd7   : > { %v971_v18 = vadd.f32 %v970_v7, %v956_v29  ;;  %v1004_v46 = vadd.f32 %v1003_v41, %v989_v20 }
  0xd9   : > { %972 = vadd.xlane.f32.xlu1 %v971_v18  ;;  %v1005_v19 = vadd.f32 %v1004_v46, %v990_v43 }
  0xdb   : > { %v1006_v8 = vadd.f32 %v1005_v19, %v991_v47 }
  0xdd   : > { %1007 = vadd.xlane.f32.xlu0 %v1006_v8 }
 0x162   : > { %v973_v38 = vpop.xlane.xlu1 %972 }
 0x163   : > { %975 = vst.msk [vmem:[%s224_s24] sm:$0xff] %vm974_vm0, %v973_v38 }
 0x166   : > { %v1008_v4 = vpop.xlane.xlu0 %1007 }
 0x167   : > { %1009 = vst.msk [vmem:[%s232_s28] sm:$0xff] %vm974_vm0, %v1008_v4 }
 0x168 PF: > { %s17_s19 = sadd.s32 1, %s1326_s19   ;;  %s1969_s12 = smov %s1302_s13 }
 0x169   : > { %p14_p9 = scmp.ge.s32.totalorder %s17_s19, 6   ;;  %s1970_s13 = smov %s1306_s14 }
 0x16a   : > { %s1971_s14 = smov %s1420_s5  ;;  %s1972_s15 = smov %s1318_s17 }
 0x16b   : > { %s1973_s16 = smov %s1322_s18  ;;  %s1974_s17 = smov %s1977_s21 }
 0x16c   : > { %s1975_s18 = smov %s1981_s22  ;;  %16 = sbr.rel (!%p14_p9) target bundleno = 5 (0x5), region = 80 }
 0x171   :  { %1055 = vsyncpa [#allocation3], 1 }
 0x172   :  { %1057 = vsyncpa [#allocation3 + $0x1], 1 }

</bundles_post_ra>
